<compile_context>
chip_gen: v5e
topology: v5e:2x2
jax: 0.10.0
libtpu: 0.0.40
codegen_flags: <defaults>
</compile_context>

<pallas_src>
import functools
import math

import jax
import jax.numpy as jnp
from jax.experimental import pallas as pl
from jax.experimental.pallas import tpu as pltpu

LN_EPS = 1e-5
_LANES = 128
_TM_DEFAULT = 1024        # logical patch rows per grid step (multiple of 256)


def _round_up(x, m):
    return (x + m - 1) // m * m


# ---------------------------------------------------------------------------
# Kernels
# ---------------------------------------------------------------------------
def _embed_ln_kernel_packed(p_ref, w_ref, s_ref, b_ref, gam_ref, bet_ref, o_ref):
    """Lane-dense path (embed_dim E < 128, g = 128//E rows packed per lane row).

    p_ref   : (tm, g*Pp)   packed im2col patches (g logical rows per phys row)
    w_ref   : (g*Pp, g*E)  block-diagonal conv weight (VMEM-resident)
    s_ref   : (g*E, g*E)   per-segment averaging matrix (blocks of 1/E)
    b_ref   : (1, g*E)     conv bias, tiled per segment
    gam_ref : (1, g*E)     LayerNorm gamma, tiled
    bet_ref : (1, g*E)     LayerNorm beta, tiled
    o_ref   : (tm, g*E)    lane-dense output (reinterpreted as (tm*g, E) outside)
    """
    y = jnp.dot(p_ref[...], w_ref[...], preferred_element_type=jnp.float32)
    y = y + b_ref[...]
    # Per-segment LayerNorm statistics via MXU (broadcast back over the segment).
    mean = jnp.dot(y, s_ref[...], preferred_element_type=jnp.float32)
    c = y - mean
    var = jnp.dot(c * c, s_ref[...], preferred_element_type=jnp.float32)
    yn = c * jax.lax.rsqrt(var + LN_EPS)            # rsqrt -> EUP slot
    o_ref[...] = (yn * gam_ref[...] + bet_ref[...]).astype(o_ref.dtype)


def _embed_ln_kernel_plain(p_ref, w_ref, b_ref, gam_ref, bet_ref, o_ref):
    """E >= 128 (or 128 % E != 0): no packing, LN via lane reductions."""
    y = jnp.dot(p_ref[...], w_ref[...], preferred_element_type=jnp.float32)
    y = y + b_ref[...]
    mean = jnp.mean(y, axis=-1, keepdims=True)
    c = y - mean
    var = jnp.mean(c * c, axis=-1, keepdims=True)
    yn = c * jax.lax.rsqrt(var + LN_EPS)
    o_ref[...] = (yn * gam_ref[...] + bet_ref[...]).astype(o_ref.dtype)


# ---------------------------------------------------------------------------
# im2col: dense strided slices (no gather, no 6-D transpose)
# ---------------------------------------------------------------------------
def _im2col_patches(x, K, S, PAD):
    """x: (B, C, H, W) -> patches (B*Ho*Wo, K*K*C), tap-major / channel-minor."""
    B, C, H, W = x.shape
    Ho = (H + 2 * PAD - K) // S + 1
    Wo = (W + 2 * PAD - K) // S + 1
    xp = jnp.pad(x, ((0, 0), (0, 0), (PAD, PAD), (PAD, PAD)))
    xh = jnp.transpose(xp, (0, 2, 3, 1))                       # NHWC once
    taps = []
    for kh in range(K):
        for kw in range(K):
            taps.append(jax.lax.slice(
                xh,
                (0, kh, kw, 0),
                (B, kh + (Ho - 1) * S + 1, kw + (Wo - 1) * S + 1, C),
                (1, S, S, 1)))                                 # (B, Ho, Wo, C)
    patches = jnp.concatenate(taps, axis=-1)                   # (B, Ho, Wo, K*K*C)
    return patches.reshape(B * Ho * Wo, K * K * C), Ho, Wo


# ---------------------------------------------------------------------------
# Wrapper
# ---------------------------------------------------------------------------
@functools.partial(
    jax.jit,
    static_argnames=("kernel_size", "stride", "padding", "compute_dtype", "tile_m"))
def overlap_patch_embed(x, conv_w, conv_b, ln_w, ln_b, *, kernel_size, stride,
                        padding, compute_dtype="float32", tile_m=_TM_DEFAULT):
    """x: (B, C, H, W) float32 NCHW. Returns ((B, Ho*Wo, E), Ho, Wo)."""
    B, C, H, W = x.shape
    E = conv_w.shape[0]
    K, S, PAD = kernel_size, stride, padding
    cdt = jnp.dtype(compute_dtype)

    patches, Ho, Wo = _im2col_patches(x, K, S, PAD)            # (M, P)
    M, P = patches.shape
    Pp = _round_up(P, _LANES)

    # Lane-dense packing factor (g logical rows share one 128-lane output row).
    g = _LANES // E if (E < _LANES and _LANES % E == 0 and E >= 8) else 1

    # Tile over M: multiple of 256 keeps the MXU M-dim and sublanes aligned.
    TM = _round_up(min(tile_m, _round_up(M, 256)), 256)
    Mp = _round_up(M, TM)
    tm = TM // g
    grid = (Mp // TM,)

    # Zero-pad rows to a tile multiple and the reduction dim to a lane multiple
    # (zeros are a no-op for the dot; padded rows are sliced off below).
    patches = jnp.pad(patches, ((0, Mp - M), (0, Pp - P))).astype(cdt)

    # Conv weight reordered to match the (kh, kw, c)-major patch layout.
    w_mat = jnp.transpose(conv_w, (2, 3, 1, 0)).reshape(P, E).astype(jnp.float32)
    w_mat = jnp.pad(w_mat, ((0, Pp - P), (0, 0)))

    bias = jnp.tile(conv_b.astype(jnp.float32), g).reshape(1, g * E)
    gamma = jnp.tile(ln_w.astype(jnp.float32), g).reshape(1, g * E)
    beta = jnp.tile(ln_b.astype(jnp.float32), g).reshape(1, g * E)

    cost = pl.CostEstimate(
        flops=2 * Mp * Pp * E + (4 * Mp * E * (g * E) if g > 1 else 4 * Mp * E),
        transcendentals=Mp,
        bytes_accessed=(patches.size * patches.dtype.itemsize
                        + g * Pp * g * E * cdt.itemsize
                        + Mp * E * 4))
    cparams = pltpu.CompilerParams(
        dimension_semantics=("parallel",),          # megacore-shardable (v7x)
        vmem_limit_bytes=64 * 1024 * 1024)

    if g > 1:
        # Pure row-major reinterpretation: g logical rows per physical row.
        patches_p = patches.reshape(Mp // g, g * Pp)
        w_big = jnp.kron(jnp.eye(g, dtype=jnp.float32), w_mat).astype(cdt)
        seg = jnp.kron(jnp.eye(g, dtype=jnp.float32),
                       jnp.full((E, E), 1.0 / E, dtype=jnp.float32))
        out = pl.pallas_call(
            _embed_ln_kernel_packed,
            out_shape=jax.ShapeDtypeStruct((Mp // g, g * E), jnp.float32),
            grid_spec=pltpu.PrefetchScalarGridSpec(
                num_scalar_prefetch=0,
                grid=grid,
                in_specs=[
                    pl.BlockSpec((tm, g * Pp), lambda i: (i, 0)),
                    pl.BlockSpec((g * Pp, g * E), lambda i: (0, 0)),
                    pl.BlockSpec((g * E, g * E), lambda i: (0, 0)),
                    pl.BlockSpec((1, g * E), lambda i: (0, 0)),
                    pl.BlockSpec((1, g * E), lambda i: (0, 0)),
                    pl.BlockSpec((1, g * E), lambda i: (0, 0)),
                ],
                out_specs=pl.BlockSpec((tm, g * E), lambda i: (i, 0)),
            ),
            compiler_params=cparams,
            cost_estimate=cost,
        )(patches_p, w_big, seg, bias, gamma, beta)
        out = out.reshape(Mp, E)
    else:
        out = pl.pallas_call(
            _embed_ln_kernel_plain,
            out_shape=jax.ShapeDtypeStruct((Mp, E), jnp.float32),
            grid_spec=pltpu.PrefetchScalarGridSpec(
                num_scalar_prefetch=0,
                grid=grid,
                in_specs=[
                    pl.BlockSpec((TM, Pp), lambda i: (i, 0)),
                    pl.BlockSpec((Pp, E), lambda i: (0, 0)),
                    pl.BlockSpec((1, E), lambda i: (0, 0)),
                    pl.BlockSpec((1, E), lambda i: (0, 0)),
                    pl.BlockSpec((1, E), lambda i: (0, 0)),
                ],
                out_specs=pl.BlockSpec((TM, E), lambda i: (i, 0)),
            ),
            compiler_params=cparams,
            cost_estimate=cost,
        )(patches, w_mat.astype(cdt), bias, gamma, beta)

    out = out[:M].reshape(B, Ho * Wo, E)
    return out, Ho, Wo


# ---------------------------------------------------------------------------
# Pure-JAX reference
# ---------------------------------------------------------------------------
def reference(x, conv_w, conv_b, ln_w, ln_b, *, kernel_size, stride, padding):
    y = jax.lax.conv_general_dilated(
        x, conv_w, window_strides=(stride, stride),
        padding=[(padding, padding), (padding, padding)],
        dimension_numbers=("NCHW", "OIHW", "NCHW"),
    ) + conv_b[None, :, None, None]
    B, E, Ho, Wo = y.shape
    y = y.reshape(B, E, Ho * Wo).transpose(0, 2, 1)            # (B, L, E)
    mean = jnp.mean(y, axis=-1, keepdims=True)
    var = jnp.mean((y - mean) ** 2, axis=-1, keepdims=True)
    y = (y - mean) / jnp.sqrt(var + LN_EPS)
    return y * ln_w + ln_b, Ho, Wo


if __name__ == "__main__":
    # Small config: img 16x16, patch_size=7, stride=4, in_chans=3
    B, C, H, W = 2, 3, 16, 16
    K, S = 7, 4
    PAD = K // 2

    key = jax.random.PRNGKey(0)
    kx, kw1, kw2 = jax.random.split(key, 3)
    x = jax.random.normal(kx, (B, C, H, W), dtype=jnp.float32)

    def make_params(k, E):
        # Matches _init_weights: Conv2d N(0, sqrt(2/fan_out)), bias 0; LN w=1, b=0.
        fan_out = K * K * E
        conv_w = jax.random.normal(k, (E, C, K, K), jnp.float32) * math.sqrt(2.0 / fan_out)
        return conv_w, jnp.zeros((E,), jnp.float32), jnp.ones((E,), jnp.float32), jnp.zeros((E,), jnp.float32)

    # --- packed (lane-dense) path: embed_dim = 32 < 128 ---------------------
    E = 32
    cw, cb, lw, lb = make_params(kw1, E)
    out, Ho, Wo = overlap_patch_embed(
        x, cw, cb, lw, lb, kernel_size=K, stride=S, padding=PAD)
    out = jax.block_until_ready(out)
    ref, rHo, rWo = reference(x, cw, cb, lw, lb, kernel_size=K, stride=S, padding=PAD)
    assert (Ho, Wo) == (rHo, rWo)
    assert out.shape == (B, Ho * Wo, E)
    assert jnp.allclose(out, ref, atol=1e-4, rtol=1e-4)

    # bf16 matmul operands (halves HBM traffic of the patch stream).
    out_bf, _, _ = overlap_patch_embed(
        x, cw, cb, lw, lb, kernel_size=K, stride=S, padding=PAD,
        compute_dtype="bfloat16")
    out_bf = jax.block_until_ready(out_bf)
    assert jnp.allclose(out_bf, ref, atol=5e-2, rtol=5e-2)

    # --- plain path: embed_dim = 128 (no packing) ----------------------------
    E2 = 128
    cw2, cb2, lw2, lb2 = make_params(kw2, E2)
    out2, Ho2, Wo2 = overlap_patch_embed(
        x, cw2, cb2, lw2, lb2, kernel_size=K, stride=S, padding=PAD)
    out2 = jax.block_until_ready(out2)
    ref2, _, _ = reference(x, cw2, cb2, lw2, lb2, kernel_size=K, stride=S, padding=PAD)
    assert out2.shape == (B, Ho2 * Wo2, E2)
    assert jnp.allclose(out2, ref2, atol=1e-4, rtol=1e-4)

    # add_loss dict is empty on the use_dcn=False path (no DCN in this config).
    add_loss = {}
    print("KERNEL_OK")
</pallas_src>

<mosaic_0001>
module attributes {stable_mosaic.version = 11 : i64} {
  func.func @_embed_ln_kernel_packed(%arg0: i32, %arg1: memref<64x1024xf32, #tpu.memory_space<vmem>>, %arg2: memref<1024x128xf32, #tpu.memory_space<vmem>>, %arg3: memref<128x128xf32, #tpu.memory_space<vmem>>, %arg4: memref<1x128xf32, #tpu.memory_space<vmem>>, %arg5: memref<1x128xf32, #tpu.memory_space<vmem>>, %arg6: memref<1x128xf32, #tpu.memory_space<vmem>>, %arg7: memref<64x128xf32, #tpu.memory_space<vmem>>) attributes {dimension_semantics = [#tpu.dimension_semantics<parallel>], iteration_bounds = array<i64: 1>, scalar_prefetch = 0 : i64, scratch_operands = 0 : i64, tpu.core_type = #tpu.core_type<tc>, window_params = [{transform_indices = @transform_0, window_bounds = array<i64: 64, 1024>}, {pipeline_mode = #tpu.pipeline_mode<synchronous>, transform_indices = @transform_1, window_bounds = array<i64: 1024, 128>}, {pipeline_mode = #tpu.pipeline_mode<synchronous>, transform_indices = @transform_2, window_bounds = array<i64: 128, 128>}, {pipeline_mode = #tpu.pipeline_mode<synchronous>, transform_indices = @transform_3, window_bounds = array<i64: 1, 128>}, {pipeline_mode = #tpu.pipeline_mode<synchronous>, transform_indices = @transform_4, window_bounds = array<i64: 1, 128>}, {pipeline_mode = #tpu.pipeline_mode<synchronous>, transform_indices = @transform_5, window_bounds = array<i64: 1, 128>}, {transform_indices = @transform_6, window_bounds = array<i64: 64, 128>}]} {
    %c0 = arith.constant 0 : index
    %c0_0 = arith.constant 0 : index
    %0 = vector.load %arg1[%c0, %c0_0] : memref<64x1024xf32, #tpu.memory_space<vmem>>, vector<64x1024xf32>
    %c0_1 = arith.constant 0 : index
    %c0_2 = arith.constant 0 : index
    %1 = vector.load %arg2[%c0_1, %c0_2] : memref<1024x128xf32, #tpu.memory_space<vmem>>, vector<1024x128xf32>
    %cst = arith.constant dense<0.000000e+00> : vector<64x128xf32>
    %2 = tpu.matmul %0, %1, %cst {dimension_numbers = #tpu.dot_dimension_numbers<[1], [0], [0], [1], [0, 0, 1, 1], [], []>} : vector<64x1024xf32>, vector<1024x128xf32>, vector<64x128xf32> -> vector<64x128xf32>
    %c0_3 = arith.constant 0 : index
    %c0_4 = arith.constant 0 : index
    %3 = vector.load %arg4[%c0_3, %c0_4] : memref<1x128xf32, #tpu.memory_space<vmem>>, vector<1x128xf32>
    %4 = vector.broadcast %3 : vector<1x128xf32> to vector<64x128xf32>
    %5 = arith.addf %2, %4 : vector<64x128xf32>
    %c0_5 = arith.constant 0 : index
    %c0_6 = arith.constant 0 : index
    %6 = vector.load %arg3[%c0_5, %c0_6] : memref<128x128xf32, #tpu.memory_space<vmem>>, vector<128x128xf32>
    %cst_7 = arith.constant dense<0.000000e+00> : vector<64x128xf32>
    %7 = tpu.matmul %5, %6, %cst_7 {dimension_numbers = #tpu.dot_dimension_numbers<[1], [0], [0], [1], [0, 0, 1, 1], [], []>} : vector<64x128xf32>, vector<128x128xf32>, vector<64x128xf32> -> vector<64x128xf32>
    %8 = arith.subf %5, %7 : vector<64x128xf32>
    %9 = arith.mulf %8, %8 : vector<64x128xf32>
    %c0_8 = arith.constant 0 : index
    %c0_9 = arith.constant 0 : index
    %10 = vector.load %arg3[%c0_8, %c0_9] : memref<128x128xf32, #tpu.memory_space<vmem>>, vector<128x128xf32>
    %cst_10 = arith.constant dense<0.000000e+00> : vector<64x128xf32>
    %11 = tpu.matmul %9, %10, %cst_10 {dimension_numbers = #tpu.dot_dimension_numbers<[1], [0], [0], [1], [0, 0, 1, 1], [], []>} : vector<64x128xf32>, vector<128x128xf32>, vector<64x128xf32> -> vector<64x128xf32>
    %cst_11 = arith.constant 9.99999974E-6 : f32
    %12 = vector.broadcast %cst_11 : f32 to vector<64x128xf32>
    %13 = arith.addf %11, %12 : vector<64x128xf32>
    %14 = math.rsqrt %13 : vector<64x128xf32>
    %15 = arith.mulf %8, %14 : vector<64x128xf32>
    %c0_12 = arith.constant 0 : index
    %c0_13 = arith.constant 0 : index
    %16 = vector.load %arg5[%c0_12, %c0_13] : memref<1x128xf32, #tpu.memory_space<vmem>>, vector<1x128xf32>
    %17 = vector.broadcast %16 : vector<1x128xf32> to vector<64x128xf32>
    %18 = arith.mulf %15, %17 : vector<64x128xf32>
    %c0_14 = arith.constant 0 : index
    %c0_15 = arith.constant 0 : index
    %19 = vector.load %arg6[%c0_14, %c0_15] : memref<1x128xf32, #tpu.memory_space<vmem>>, vector<1x128xf32>
    %20 = vector.broadcast %19 : vector<1x128xf32> to vector<64x128xf32>
    %21 = arith.addf %18, %20 : vector<64x128xf32>
    %c0_16 = arith.constant 0 : index
    %c0_17 = arith.constant 0 : index
    %22 = vector.load %arg7[%c0_16, %c0_17] : memref<64x128xf32, #tpu.memory_space<vmem>>, vector<64x128xf32>
    tpu.vector_store %arg7[%c0_16, %c0_17], %21 {strides = array<i32>} : memref<64x128xf32, #tpu.memory_space<vmem>>, vector<64x128xf32>,
    return
  }
  func.func @transform_0(%arg0: i32) -> (i32, i32) {
    %c0_i32 = arith.constant 0 : i32
    %c0_i32_0 = arith.constant 0 : i32
    return %arg0, %c0_i32 : i32, i32
  }
  func.func @transform_1(%arg0: i32) -> (i32, i32) {
    %c0_i32 = arith.constant 0 : i32
    %c0_i32_0 = arith.constant 0 : i32
    %c0_i32_1 = arith.constant 0 : i32
    return %c0_i32, %c0_i32_0 : i32, i32
  }
  func.func @transform_2(%arg0: i32) -> (i32, i32) {
    %c0_i32 = arith.constant 0 : i32
    %c0_i32_0 = arith.constant 0 : i32
    %c0_i32_1 = arith.constant 0 : i32
    return %c0_i32, %c0_i32_0 : i32, i32
  }
  func.func @transform_3(%arg0: i32) -> (i32, i32) {
    %c0_i32 = arith.constant 0 : i32
    %c0_i32_0 = arith.constant 0 : i32
    %c0_i32_1 = arith.constant 0 : i32
    return %c0_i32, %c0_i32_0 : i32, i32
  }
  func.func @transform_4(%arg0: i32) -> (i32, i32) {
    %c0_i32 = arith.constant 0 : i32
    %c0_i32_0 = arith.constant 0 : i32
    %c0_i32_1 = arith.constant 0 : i32
    return %c0_i32, %c0_i32_0 : i32, i32
  }
  func.func @transform_5(%arg0: i32) -> (i32, i32) {
    %c0_i32 = arith.constant 0 : i32
    %c0_i32_0 = arith.constant 0 : i32
    %c0_i32_1 = arith.constant 0 : i32
    return %c0_i32, %c0_i32_0 : i32, i32
  }
  func.func @transform_6(%arg0: i32) -> (i32, i32) {
    %c0_i32 = arith.constant 0 : i32
    %c0_i32_0 = arith.constant 0 : i32
    return %arg0, %c0_i32 : i32, i32
  }
}

</mosaic_0001>

<bundles_post_ra>
// kernel: tile.18
= control target key start
LH: loop header
LB: loop body
LE: loop exit
PB: predicated region body
PF: predicated region fallthrough
CT: control target
= control target key end

     0   :  { %s22_s0 = inlined_call_operand.vmem [shape: f32[32], index: 0, kind: input, shape index: {}]   ;;  %s23_s1 = inlined_call_operand.vmem [shape: f32[4,32], index: 1, kind: output, shape index: {}]  }
   0x1   :  { %v4_v0 = vld [vmem:[%s22_s0] ss:$0 sm:$0xff] }
   0x2   :  { %5 = vst [vmem:[%s23_s1] sm:$0xf] %v4_v0 }

// kernel: tile.19
= control target key start
LH: loop header
LB: loop body
LE: loop exit
PB: predicated region body
PF: predicated region fallthrough
CT: control target
= control target key end

     0   :  { %s37_s8 = smov 32   ;;  %s38_s9 = smov 64   ;;  %vm7_vm0 = vcmask 261120   ;;  %vm13_vm1 = vcmask 1048320   ;;  %vm19_vm2 = vcmask 785920   ;;  %vm25_vm3 = vcmask 523520   ;;  %s55_s0 = inlined_call_operand.vmem [shape: f32[4,32], index: 0, kind: input, shape index: {}]   ;;  %s56_s1 = inlined_call_operand.vmem [shape: f32[1,128], index: 1, kind: output, shape index: {}]  }
   0x1   :  { %v4_v0 = vld [vmem:[%s55_s0] sm:$0xf]  ;;  %s36_s0 = smov 96  }
   0x2   :  { %5 = vst [vmem:[#allocation1] sm:$0xf] %v4_v0 }
   0x9   :  { %v10_v1 = vld [vmem:[#allocation1 + $0x3] sm:$0x1]   ;;  %v22_v2 = vld [vmem:[#allocation1 + $0x1] sm:$0x1]   ;;  %v16_v3 = vld [vmem:[#allocation1 + $0x2] sm:$0x1]  }
   0xa   :  { %11 = vrot.lane.b32.xlu0 %v10_v1, %s36_s0  ;;  %23 = vrot.lane.b32.xlu1 %v22_v2, %s37_s8  ;;  %v6_v4 = vld [vmem:[#allocation1] sm:$0x1]  }
   0xb   :  { %8 = vst.msk [vmem:[#allocation0] sm:$0x1] %vm7_vm0, %v6_v4  }
  0x12   :  { %17 = vrot.lane.b32.xlu0 %v16_v3, %s38_s9 }
  0x7c   :  { %v12_v5 = vpop.permute.xlu0 %11   ;;  %v24_v6 = vpop.permute.xlu1 %23  }
  0x7d   :  { %14 = vst.msk [vmem:[#allocation0] sm:$0x1] %vm13_vm1, %v12_v5  }
  0x84   :  { %v18_v7 = vpop.permute.xlu0 %17  }
  0x85   :  { %20 = vst.msk [vmem:[#allocation0] sm:$0x1] %vm19_vm2, %v18_v7  }
  0x86   :  { %26 = vst.msk [vmem:[#allocation0] sm:$0x1] %vm25_vm3, %v24_v6  }
  0x8d   :  { %v29_v8 = vld [vmem:[#allocation0] sm:$0x1] }
  0x8e   :  { %32 = vst [vmem:[%s56_s1] sm:$0x1] %v29_v8 }

// kernel: overlap_patch_embed.1
= control target key start
LH: loop header
LB: loop body
LE: loop exit
PB: predicated region body
PF: predicated region fallthrough
CT: control target
= control target key end

     0   :  { %s1628_s1 = inlined_call_operand.vmem [shape: f32[1024,128], index: 1, kind: input, shape index: {}]   ;;  %s1629_s0 = inlined_call_operand.vmem [shape: f32[64,1024], index: 0, kind: input, shape index: {}]   ;;  %s1630_s3 = inlined_call_operand.vmem [shape: f32[1,128], index: 3, kind: input, shape index: {}]   ;;  %s1631_s2 = inlined_call_operand.vmem [shape: f32[128,128], index: 2, kind: input, shape index: {}]   ;;  %s1632_s4 = inlined_call_operand.vmem [shape: f32[1,128], index: 4, kind: input, shape index: {}]   ;;  %s1633_s5 = inlined_call_operand.vmem [shape: f32[1,128], index: 5, kind: input, shape index: {}]   ;;  %s1634_s6 = inlined_call_operand.vmem [shape: f32[64,128], index: 6, kind: output, shape index: {}]  }
   0x1   :  { %v102_v0 = vld [vmem:[%s1628_s1 + $0x78] sm:$0xff]  ;;  %v101_v1 = vld [vmem:[%s1628_s1 + $0x70] sm:$0xff]  ;;  %v100_v4 = vld [vmem:[%s1628_s1 + $0x68] sm:$0xff] }
   0x2   :  { %v118_v2 = vld [vmem:[%s1628_s1 + $0xf8] sm:$0xff]  ;;  %785 = vmatpush.msra.mxu2 %v102_v0  ;;  %v117_v3 = vld [vmem:[%s1628_s1 + $0xf0] sm:$0xff]  ;;  %v116_v5 = vld [vmem:[%s1628_s1 + $0xe8] sm:$0xff]  ;;  %219 = vmatpush.msra.mxu0 %v102_v0 }
   0x3   :  { %801 = vmatpush.msra.mxu3 %v118_v2  ;;  %260 = vmatpush.msra.mxu1 %v118_v2  ;;  %v99_v6 = vld [vmem:[%s1628_s1 + $0x60] sm:$0xff]  ;;  %v98_v8 = vld [vmem:[%s1628_s1 + $0x58] sm:$0xff]  ;;  %v97_v10 = vld [vmem:[%s1628_s1 + $0x50] sm:$0xff] }
   0x4   :  { %786 = vmatpush.msra.mxu2 %v101_v1  ;;  %v115_v7 = vld [vmem:[%s1628_s1 + $0xe0] sm:$0xff]  ;;  %220 = vmatpush.msra.mxu0 %v101_v1  ;;  %v114_v9 = vld [vmem:[%s1628_s1 + $0xd8] sm:$0xff]  ;;  %v113_v11 = vld [vmem:[%s1628_s1 + $0xd0] sm:$0xff] }
   0x5   :  { %802 = vmatpush.msra.mxu3 %v117_v3  ;;  %261 = vmatpush.msra.mxu1 %v117_v3  ;;  %v96_v12 = vld [vmem:[%s1628_s1 + $0x48] sm:$0xff]  ;;  %v95_v14 = vld [vmem:[%s1628_s1 + $0x40] sm:$0xff]  ;;  %v94_v16 = vld [vmem:[%s1628_s1 + $0x38] sm:$0xff] }
   0x6   :  { %787 = vmatpush.msra.mxu2 %v100_v4  ;;  %221 = vmatpush.msra.mxu0 %v100_v4  ;;  %v112_v13 = vld [vmem:[%s1628_s1 + $0xc8] sm:$0xff]  ;;  %v111_v15 = vld [vmem:[%s1628_s1 + $0xc0] sm:$0xff]  ;;  %v110_v17 = vld [vmem:[%s1628_s1 + $0xb8] sm:$0xff] }
   0x7   :  { %803 = vmatpush.msra.mxu3 %v116_v5  ;;  %262 = vmatpush.msra.mxu1 %v116_v5  ;;  %v93_v18 = vld [vmem:[%s1628_s1 + $0x30] sm:$0xff]  ;;  %v92_v20 = vld [vmem:[%s1628_s1 + $0x28] sm:$0xff]  ;;  %v91_v22 = vld [vmem:[%s1628_s1 + $0x20] sm:$0xff] }
   0x8   :  { %788 = vmatpush.msra.mxu2 %v99_v6  ;;  %222 = vmatpush.msra.mxu0 %v99_v6  ;;  %v109_v19 = vld [vmem:[%s1628_s1 + $0xb0] sm:$0xff]  ;;  %v108_v21 = vld [vmem:[%s1628_s1 + $0xa8] sm:$0xff]  ;;  %v107_v23 = vld [vmem:[%s1628_s1 + $0xa0] sm:$0xff] }
   0x9   :  { %804 = vmatpush.msra.mxu3 %v115_v7  ;;  %263 = vmatpush.msra.mxu1 %v115_v7  ;;  %v90_v24 = vld [vmem:[%s1628_s1 + $0x18] sm:$0xff]  ;;  %v89_v26 = vld [vmem:[%s1628_s1 + $0x10] sm:$0xff]  ;;  %v88_v28 = vld [vmem:[%s1628_s1 + $0x8] sm:$0xff] }
   0xa   :  { %789 = vmatpush.msra.mxu2 %v98_v8  ;;  %223 = vmatpush.msra.mxu0 %v98_v8  ;;  %v106_v25 = vld [vmem:[%s1628_s1 + $0x98] sm:$0xff]  ;;  %v105_v27 = vld [vmem:[%s1628_s1 + $0x90] sm:$0xff]  ;;  %v104_v29 = vld [vmem:[%s1628_s1 + $0x88] sm:$0xff] }
   0xb   :  { %805 = vmatpush.msra.mxu3 %v114_v9  ;;  %264 = vmatpush.msra.mxu1 %v114_v9  ;;  %v87_v30 = vld [vmem:[%s1628_s1] sm:$0xff]  ;;  %v56_v33 = vld [vmem:[%s1629_s0 + $0x108] sm:$0xff]  ;;  %v134_v34 = vld [vmem:[%s1628_s1 + $0x178] sm:$0xff] }
   0xc   :  { %790 = vmatpush.msra.mxu2 %v97_v10  ;;  %224 = vmatpush.msra.mxu0 %v97_v10  ;;  %v103_v31 = vld [vmem:[%s1628_s1 + $0x80] sm:$0xff]  ;;  %v150_v35 = vld [vmem:[%s1628_s1 + $0x1f8] sm:$0xff]  ;;  %v133_v36 = vld [vmem:[%s1628_s1 + $0x170] sm:$0xff] }
   0xd   :  { %806 = vmatpush.msra.mxu3 %v113_v11  ;;  %265 = vmatpush.msra.mxu1 %v113_v11  ;;  %v55_v32 = vld [vmem:[%s1629_s0 + $0x100] sm:$0xff]  ;;  %v149_v37 = vld [vmem:[%s1628_s1 + $0x1f0] sm:$0xff]  ;;  %v24_v39 = vld [vmem:[%s1629_s0 + $0x8] sm:$0xff] }
   0xe   :  { %791 = vmatpush.msra.mxu2 %v96_v12  ;;  %225 = vmatpush.msra.mxu0 %v96_v12  ;;  %v23_v38 = vld [vmem:[%s1629_s0] sm:$0xff]  ;;  %v132_v40 = vld [vmem:[%s1628_s1 + $0x168] sm:$0xff]  ;;  %v166_v42 = vld [vmem:[%s1628_s1 + $0x278] sm:$0xff] }
   0xf   :  { %807 = vmatpush.msra.mxu3 %v112_v13  ;;  %266 = vmatpush.msra.mxu1 %v112_v13  ;;  %v148_v41 = vld [vmem:[%s1628_s1 + $0x1e8] sm:$0xff]  ;;  %v182_v43 = vld [vmem:[%s1628_s1 + $0x2f8] sm:$0xff]  ;;  %v131_v44 = vld [vmem:[%s1628_s1 + $0x160] sm:$0xff] }
  0x10   :  { %792 = vmatpush.msra.mxu2 %v95_v14  ;;  %226 = vmatpush.msra.mxu0 %v95_v14  ;;  %v147_v45 = vld [vmem:[%s1628_s1 + $0x1e0] sm:$0xff]  ;;  %v64_v47 = vld [vmem:[%s1629_s0 + $0x148] sm:$0xff]  ;;  %v130_v48 = vld [vmem:[%s1628_s1 + $0x158] sm:$0xff] }
  0x11   :  { %808 = vmatpush.msra.mxu3 %v111_v15  ;;  %267 = vmatpush.msra.mxu1 %v111_v15  ;;  %v63_v46 = vld [vmem:[%s1629_s0 + $0x140] sm:$0xff]  ;;  %v146_v49 = vld [vmem:[%s1628_s1 + $0x1d8] sm:$0xff]  ;;  %v165_v50 = vld [vmem:[%s1628_s1 + $0x270] sm:$0xff] }
  0x12   :  { %793 = vmatpush.msra.mxu2 %v94_v16  ;;  %227 = vmatpush.msra.mxu0 %v94_v16  ;;  %v181_v51 = vld [vmem:[%s1628_s1 + $0x2f0] sm:$0xff]  ;;  %v164_v54 = vld [vmem:[%s1628_s1 + $0x268] sm:$0xff]  ;;  %v163_v58 = vld [vmem:[%s1628_s1 + $0x260] sm:$0xff] }
  0x13   :  { %809 = vmatpush.msra.mxu3 %v110_v17  ;;  %268 = vmatpush.msra.mxu1 %v110_v17  ;;  %v129_v52 = vld [vmem:[%s1628_s1 + $0x150] sm:$0xff]  ;;  %v180_v55 = vld [vmem:[%s1628_s1 + $0x2e8] sm:$0xff]  ;;  %v179_v59 = vld [vmem:[%s1628_s1 + $0x2e0] sm:$0xff] }
  0x14   :  { %794 = vmatpush.msra.mxu2 %v93_v18  ;;  %228 = vmatpush.msra.mxu0 %v93_v18  ;;  %v145_v53 = vld [vmem:[%s1628_s1 + $0x1d0] sm:$0xff]  ;;  %v128_v56 = vld [vmem:[%s1628_s1 + $0x148] sm:$0xff]  ;;  %v127_v60 = vld [vmem:[%s1628_s1 + $0x140] sm:$0xff] }
  0x15   :  { %810 = vmatpush.msra.mxu3 %v109_v19  ;;  %269 = vmatpush.msra.mxu1 %v109_v19  ;;  %v144_v57 = vld [vmem:[%s1628_s1 + $0x1c8] sm:$0xff]  ;;  %v143_v61 = vld [vmem:[%s1628_s1 + $0x1c0] sm:$0xff]  ;;  %v126_v0 = vld [vmem:[%s1628_s1 + $0x138] sm:$0xff] }
  0x16   :  { %795 = vmatpush.msra.mxu2 %v92_v20  ;;  %229 = vmatpush.msra.mxu0 %v92_v20  ;;  %v71_v62 = vld [vmem:[%s1629_s0 + $0x180] sm:$0xff]  ;;  %v72_v1 = vld [vmem:[%s1629_s0 + $0x188] sm:$0xff]  ;;  %v142_v2 = vld [vmem:[%s1628_s1 + $0x1b8] sm:$0xff] }
  0x17   :  { %811 = vmatpush.msra.mxu3 %v108_v21  ;;  %270 = vmatpush.msra.mxu1 %v108_v21  ;;  %v31_v63 = vld [vmem:[%s1629_s0 + $0x40] sm:$0xff]  ;;  %v162_v3 = vld [vmem:[%s1628_s1 + $0x258] sm:$0xff]  ;;  %v125_v4 = vld [vmem:[%s1628_s1 + $0x130] sm:$0xff] }
  0x18   :  { %796 = vmatpush.msra.mxu2 %v91_v22  ;;  %230 = vmatpush.msra.mxu0 %v91_v22  ;;  %v32_v5 = vld [vmem:[%s1629_s0 + $0x48] sm:$0xff]  ;;  %v141_v6 = vld [vmem:[%s1628_s1 + $0x1b0] sm:$0xff]  ;;  %v178_v9 = vld [vmem:[%s1628_s1 + $0x2d8] sm:$0xff] }
  0x19   :  { %812 = vmatpush.msra.mxu3 %v107_v23  ;;  %271 = vmatpush.msra.mxu1 %v107_v23  ;;  %v161_v7 = vld [vmem:[%s1628_s1 + $0x250] sm:$0xff]  ;;  %v124_v8 = vld [vmem:[%s1628_s1 + $0x128] sm:$0xff]  ;;  %v123_v12 = vld [vmem:[%s1628_s1 + $0x120] sm:$0xff] }
  0x1a   :  { %797 = vmatpush.msra.mxu2 %v90_v24  ;;  %231 = vmatpush.msra.mxu0 %v90_v24  ;;  %v140_v10 = vld [vmem:[%s1628_s1 + $0x1a8] sm:$0xff]  ;;  %v177_v13 = vld [vmem:[%s1628_s1 + $0x2d0] sm:$0xff]  ;;  %v79_v14 = vld [vmem:[%s1629_s0 + $0x1c0] sm:$0xff] }
  0x1b   :  { %813 = vmatpush.msra.mxu3 %v106_v25  ;;  %272 = vmatpush.msra.mxu1 %v106_v25  ;;  %v160_v11 = vld [vmem:[%s1628_s1 + $0x248] sm:$0xff]  ;;  %v139_v15 = vld [vmem:[%s1628_s1 + $0x1a0] sm:$0xff]  ;;  %v122_v16 = vld [vmem:[%s1628_s1 + $0x118] sm:$0xff] }
  0x1c   :  { %798 = vmatpush.msra.mxu2 %v89_v26  ;;  %232 = vmatpush.msra.mxu0 %v89_v26  ;;  %v159_v17 = vld [vmem:[%s1628_s1 + $0x240] sm:$0xff]  ;;  %v176_v18 = vld [vmem:[%s1628_s1 + $0x2c8] sm:$0xff]  ;;  %v121_v21 = vld [vmem:[%s1628_s1 + $0x110] sm:$0xff] }
  0x1d   :  { %814 = vmatpush.msra.mxu3 %v105_v27  ;;  %273 = vmatpush.msra.mxu1 %v105_v27  ;;  %v39_v19 = vld [vmem:[%s1629_s0 + $0x80] sm:$0xff]  ;;  %v80_v20 = vld [vmem:[%s1629_s0 + $0x1c8] sm:$0xff]  ;;  %v138_v22 = vld [vmem:[%s1628_s1 + $0x198] sm:$0xff] }
  0x1e   :  { %799 = vmatpush.msra.mxu2 %v88_v28  ;;  %233 = vmatpush.msra.mxu0 %v88_v28  ;;  %v158_v23 = vld [vmem:[%s1628_s1 + $0x238] sm:$0xff]  ;;  %v175_v24 = vld [vmem:[%s1628_s1 + $0x2c0] sm:$0xff]  ;;  %v120_v25 = vld [vmem:[%s1628_s1 + $0x108] sm:$0xff] }
  0x1f   :  { %815 = vmatpush.msra.mxu3 %v104_v29  ;;  %274 = vmatpush.msra.mxu1 %v104_v29  ;;  %v40_v26 = vld [vmem:[%s1629_s0 + $0x88] sm:$0xff]  ;;  %v137_v27 = vld [vmem:[%s1628_s1 + $0x190] sm:$0xff]  ;;  %v174_v29 = vld [vmem:[%s1628_s1 + $0x2b8] sm:$0xff] }
  0x20   :  { %800 = vmatpush.msra.mxu2 %v87_v30  ;;  %234 = vmatpush.msra.mxu0 %v87_v30  ;;  %v157_v28 = vld [vmem:[%s1628_s1 + $0x230] sm:$0xff]  ;;  %v119_v30 = vld [vmem:[%s1628_s1 + $0x100] sm:$0xff] }
  0x21   :  { %816 = vmatpush.msra.mxu3 %v103_v31  ;;  %247 = vmatmul.f32.vlgmr.msra.gmra.mxu2 %v55_v32  ;;  %v156_v32 = vld [vmem:[%s1628_s1 + $0x228] sm:$0xff] }
  0x22   :  { %288 = vmatmul.f32.vlgmr.msra.gmra.mxu3 %v56_v33  ;;  %301 = vmatpush.msrb.mxu2 %v134_v34  ;;  %v173_v33 = vld [vmem:[%s1628_s1 + $0x2b0] sm:$0xff] }
  0x23   :  { %342 = vmatpush.msrb.mxu3 %v150_v35  ;;  %275 = vmatpush.msra.mxu1 %v103_v31  ;;  %v136_v31 = vld [vmem:[%s1628_s1 + $0x188] sm:$0xff]  ;;  %v25_v34 = vld [vmem:[%s1629_s0 + $0x10] sm:$0xff]  ;;  %v135_v35 = vld [vmem:[%s1628_s1 + $0x180] sm:$0xff] }
  0x24   :  { %302 = vmatpush.msrb.mxu2 %v133_v36  ;;  %235 = vmatmul.f32.vlgmr.msra.gmra.mxu0 %v23_v38  ;;  %v198_v36 = vld [vmem:[%s1628_s1 + $0x378] sm:$0xff]  ;;  %v172_v38 = vld [vmem:[%s1628_s1 + $0x2a8] sm:$0xff] }
  0x25   :  { %343 = vmatpush.msrb.mxu3 %v149_v37  ;;  %276 = vmatmul.f32.vlgmr.msra.gmra.mxu1 %v24_v39  ;;  %v155_v37 = vld [vmem:[%s1628_s1 + $0x220] sm:$0xff] }
  0x26   :  { %303 = vmatpush.msrb.mxu2 %v132_v40  ;;  %383 = vmatpush.msrb.mxu0 %v166_v42  ;;  %v47_v39 = vld [vmem:[%s1629_s0 + $0xc0] sm:$0xff]  ;;  %v26_v40 = vld [vmem:[%s1629_s0 + $0x18] sm:$0xff] }
  0x27   :  { %344 = vmatpush.msrb.mxu3 %v148_v41  ;;  %424 = vmatpush.msrb.mxu1 %v182_v43  ;;  %v154_v41 = vld [vmem:[%s1628_s1 + $0x218] sm:$0xff]  ;;  %v171_v43 = vld [vmem:[%s1628_s1 + $0x2a0] sm:$0xff] }
  0x28   :  { %304 = vmatpush.msrb.mxu2 %v131_v44  ;;  %384 = vmatpush.msrb.mxu0 %v165_v50  ;;  %v214_v42 = vld [vmem:[%s1628_s1 + $0x3f8] sm:$0xff]  ;;  %v48_v44 = vld [vmem:[%s1629_s0 + $0xc8] sm:$0xff] }
  0x29   :  { %345 = vmatpush.msrb.mxu3 %v147_v45  ;;  %250 = vmatmul.f32.gmra.mxu2 %v63_v46  ;;  %v197_v45 = vld [vmem:[%s1628_s1 + $0x370] sm:$0xff]  ;;  %v152_v50 = vld [vmem:[%s1628_s1 + $0x208] sm:$0xff] }
  0x2a   :  { %291 = vmatmul.f32.gmra.mxu3 %v64_v47  ;;  %305 = vmatpush.msrb.mxu2 %v130_v48  ;;  %v153_v46 = vld [vmem:[%s1628_s1 + $0x210] sm:$0xff]  ;;  %v170_v47 = vld [vmem:[%s1628_s1 + $0x298] sm:$0xff] }
  0x2b   :  { %346 = vmatpush.msrb.mxu3 %v146_v49  ;;  %425 = vmatpush.msrb.mxu1 %v181_v51  ;;  %v213_v48 = vld [vmem:[%s1628_s1 + $0x3f0] sm:$0xff]  ;;  %v196_v49 = vld [vmem:[%s1628_s1 + $0x368] sm:$0xff] }
  0x2c   :  { %306 = vmatpush.msrb.mxu2 %v129_v52  ;;  %385 = vmatpush.msrb.mxu0 %v164_v54  ;;  %v169_v51 = vld [vmem:[%s1628_s1 + $0x290] sm:$0xff]  ;;  %v151_v54 = vld [vmem:[%s1628_s1 + $0x200] sm:$0xff] }
  0x2d   :  { %347 = vmatpush.msrb.mxu3 %v145_v53  ;;  %426 = vmatpush.msrb.mxu1 %v180_v55  ;;  %v33_v52 = vld [vmem:[%s1629_s0 + $0x50] sm:$0xff]  ;;  %v212_v53 = vld [vmem:[%s1628_s1 + $0x3e8] sm:$0xff] }
  0x2e   :  { %307 = vmatpush.msrb.mxu2 %v128_v56  ;;  %386 = vmatpush.msrb.mxu0 %v163_v58  ;;  %v168_v55 = vld [vmem:[%s1628_s1 + $0x288] sm:$0xff]  ;;  %v34_v56 = vld [vmem:[%s1629_s0 + $0x58] sm:$0xff]  ;;  %v167_v58 = vld [vmem:[%s1628_s1 + $0x280] sm:$0xff] }
  0x2f   :  { %348 = vmatpush.msrb.mxu3 %v144_v57  ;;  %427 = vmatpush.msrb.mxu1 %v179_v59  ;;  %v27_v57 = vld [vmem:[%s1629_s0 + $0x20] sm:$0xff] }
  0x30   :  { %308 = vmatpush.msrb.mxu2 %v127_v60  ;;  %238 = vmatmul.f32.gmra.mxu0 %v31_v63  ;;  %v195_v59 = vld [vmem:[%s1628_s1 + $0x360] sm:$0xff]  ;;  %v28_v60 = vld [vmem:[%s1629_s0 + $0x28] sm:$0xff]  ;;  %v210_v63 = vld [vmem:[%s1628_s1 + $0x3d8] sm:$0xff] }
  0x31   :  { %349 = vmatpush.msrb.mxu3 %v143_v61  ;;  %253 = vmatmul.f32.gmra.mxu2 %v71_v62  ;;  %v211_v61 = vld [vmem:[%s1628_s1 + $0x3e0] sm:$0xff]  ;;  %v194_v62 = vld [vmem:[%s1628_s1 + $0x358] sm:$0xff] }
  0x32   :  { %309 = vmatpush.msrb.mxu2 %v126_v0  ;;  %294 = vmatmul.f32.gmra.mxu3 %v72_v1  ;;  %v193_v0 = vld [vmem:[%s1628_s1 + $0x350] sm:$0xff] }
  0x33   :  { %350 = vmatpush.msrb.mxu3 %v142_v2  ;;  %387 = vmatpush.msrb.mxu0 %v162_v3  ;;  %v41_v1 = vld [vmem:[%s1629_s0 + $0x90] sm:$0xff]  ;;  %v192_v3 = vld [vmem:[%s1628_s1 + $0x348] sm:$0xff] }
  0x34   :  { %310 = vmatpush.msrb.mxu2 %v125_v4  ;;  %279 = vmatmul.f32.gmra.mxu1 %v32_v5  ;;  %v209_v2 = vld [vmem:[%s1628_s1 + $0x3d0] sm:$0xff]  ;;  %v42_v4 = vld [vmem:[%s1629_s0 + $0x98] sm:$0xff]  ;;  %v35_v5 = vld [vmem:[%s1629_s0 + $0x60] sm:$0xff] }
  0x35   :  { %351 = vmatpush.msrb.mxu3 %v141_v6  ;;  %388 = vmatpush.msrb.mxu0 %v161_v7  ;;  %v208_v6 = vld [vmem:[%s1628_s1 + $0x3c8] sm:$0xff]  ;;  %v191_v7 = vld [vmem:[%s1628_s1 + $0x340] sm:$0xff] }
  0x36   :  { %311 = vmatpush.msrb.mxu2 %v124_v8  ;;  %428 = vmatpush.msrb.mxu1 %v178_v9  ;;  %v36_v8 = vld [vmem:[%s1629_s0 + $0x68] sm:$0xff]  ;;  %v207_v9 = vld [vmem:[%s1628_s1 + $0x3c0] sm:$0xff] }
  0x37   :  { %352 = vmatpush.msrb.mxu3 %v140_v10  ;;  %389 = vmatpush.msrb.mxu0 %v160_v11  ;;  %v190_v10 = vld [vmem:[%s1628_s1 + $0x338] sm:$0xff] }
  0x38   :  { %312 = vmatpush.msrb.mxu2 %v123_v12  ;;  %429 = vmatpush.msrb.mxu1 %v177_v13  ;;  %v206_v11 = vld [vmem:[%s1628_s1 + $0x3b8] sm:$0xff]  ;;  %v189_v12 = vld [vmem:[%s1628_s1 + $0x330] sm:$0xff] }
  0x39   :  { %256 = vmatmul.f32.gmra.mxu2 %v79_v14  ;;  %353 = vmatpush.msrb.mxu3 %v139_v15  ;;  %v49_v13 = vld [vmem:[%s1629_s0 + $0xd0] sm:$0xff]  ;;  %v188_v15 = vld [vmem:[%s1628_s1 + $0x328] sm:$0xff] }
  0x3a   :  { %313 = vmatpush.msrb.mxu2 %v122_v16  ;;  %390 = vmatpush.msrb.mxu0 %v159_v17  ;;  %v205_v14 = vld [vmem:[%s1628_s1 + $0x3b0] sm:$0xff]  ;;  %v50_v16 = vld [vmem:[%s1629_s0 + $0xd8] sm:$0xff]  ;;  %v43_v17 = vld [vmem:[%s1629_s0 + $0xa0] sm:$0xff] }
  0x3b   :  { %430 = vmatpush.msrb.mxu1 %v176_v18  ;;  %241 = vmatmul.f32.gmra.mxu0 %v39_v19  ;;  %v204_v18 = vld [vmem:[%s1628_s1 + $0x3a8] sm:$0xff]  ;;  %v187_v19 = vld [vmem:[%s1628_s1 + $0x320] sm:$0xff] }
  0x3c   :  { %297 = vmatmul.f32.gmra.mxu3 %v80_v20  ;;  %314 = vmatpush.msrb.mxu2 %v121_v21  ;;  %v44_v20 = vld [vmem:[%s1629_s0 + $0xa8] sm:$0xff]  ;;  %v203_v21 = vld [vmem:[%s1628_s1 + $0x3a0] sm:$0xff] }
  0x3d   :  { %354 = vmatpush.msrb.mxu3 %v138_v22  ;;  %391 = vmatpush.msrb.mxu0 %v158_v23  ;;  %v186_v22 = vld [vmem:[%s1628_s1 + $0x318] sm:$0xff] }
  0x3e   :  { %431 = vmatpush.msrb.mxu1 %v175_v24  ;;  %315 = vmatpush.msrb.mxu2 %v120_v25  ;;  %v202_v23 = vld [vmem:[%s1628_s1 + $0x398] sm:$0xff]  ;;  %v185_v24 = vld [vmem:[%s1628_s1 + $0x310] sm:$0xff] }
  0x3f   :  { %282 = vmatmul.f32.gmra.mxu1 %v40_v26  ;;  %355 = vmatpush.msrb.mxu3 %v137_v27  ;;  %v57_v25 = vld [vmem:[%s1629_s0 + $0x110] sm:$0xff]  ;;  %v184_v27 = vld [vmem:[%s1628_s1 + $0x308] sm:$0xff] }
  0x40   :  { %392 = vmatpush.msrb.mxu0 %v157_v28  ;;  %432 = vmatpush.msrb.mxu1 %v174_v29  ;;  %v201_v26 = vld [vmem:[%s1628_s1 + $0x390] sm:$0xff]  ;;  %v58_v28 = vld [vmem:[%s1629_s0 + $0x118] sm:$0xff]  ;;  %v51_v29 = vld [vmem:[%s1629_s0 + $0xe0] sm:$0xff] }
  0x41   :  { %316 = vmatpush.msrb.mxu2 %v119_v30  ;;  %356 = vmatpush.msrb.mxu3 %v136_v31  ;;  %v200_v30 = vld [vmem:[%s1628_s1 + $0x388] sm:$0xff]  ;;  %v183_v31 = vld [vmem:[%s1628_s1 + $0x300] sm:$0xff] }
  0x42   :  { %393 = vmatpush.msrb.mxu0 %v156_v32  ;;  %433 = vmatpush.msrb.mxu1 %v173_v33  ;;  %v52_v32 = vld [vmem:[%s1629_s0 + $0xe8] sm:$0xff]  ;;  %v199_v33 = vld [vmem:[%s1628_s1 + $0x380] sm:$0xff] }
  0x43   :  { %317 = vmatmul.f32.vlgmr.msrb.gmra.mxu2 %v25_v34  ;;  %357 = vmatpush.msrb.mxu3 %v135_v35  ;;  %v65_v34 = vld [vmem:[%s1629_s0 + $0x150] sm:$0xff]  ;;  %v66_v35 = vld [vmem:[%s1629_s0 + $0x158] sm:$0xff] }
  0x44   :  { %465 = vmatpush.msra.mxu2 %v198_v36  ;;  %394 = vmatpush.msrb.mxu0 %v155_v37  ;;  %v59_v36 = vld [vmem:[%s1629_s0 + $0x120] sm:$0xff]  ;;  %v60_v37 = vld [vmem:[%s1629_s0 + $0x128] sm:$0xff] }
  0x45   :  { %434 = vmatpush.msrb.mxu1 %v172_v38  ;;  %244 = vmatmul.f32.gmra.mxu0 %v47_v39  ;;  %v73_v38 = vld [vmem:[%s1629_s0 + $0x190] sm:$0xff]  ;;  %v74_v39 = vld [vmem:[%s1629_s0 + $0x198] sm:$0xff] }
  0x46   :  { %358 = vmatmul.f32.vlgmr.msrb.gmra.mxu3 %v26_v40  ;;  %395 = vmatpush.msrb.mxu0 %v154_v41  ;;  %v67_v40 = vld [vmem:[%s1629_s0 + $0x160] sm:$0xff]  ;;  %v68_v41 = vld [vmem:[%s1629_s0 + $0x168] sm:$0xff] }
  0x47   :  { %506 = vmatpush.msra.mxu3 %v214_v42  ;;  %435 = vmatpush.msrb.mxu1 %v171_v43  ;;  %v81_v42 = vld [vmem:[%s1629_s0 + $0x1d0] sm:$0xff]  ;;  %v82_v43 = vld [vmem:[%s1629_s0 + $0x1d8] sm:$0xff] }
  0x48   :  { %285 = vmatmul.f32.gmra.mxu1 %v48_v44  ;;  %466 = vmatpush.msra.mxu2 %v197_v45  ;;  %v75_v44 = vld [vmem:[%s1629_s0 + $0x1a0] sm:$0xff]  ;;  %v76_v45 = vld [vmem:[%s1629_s0 + $0x1a8] sm:$0xff] }
  0x49   :  { %396 = vmatpush.msrb.mxu0 %v153_v46  ;;  %436 = vmatpush.msrb.mxu1 %v170_v47  ;;  %v29_v46 = vld [vmem:[%s1629_s0 + $0x30] sm:$0xff]  ;;  %v83_v47 = vld [vmem:[%s1629_s0 + $0x1e0] sm:$0xff] }
  0x4a   :  { %507 = vmatpush.msra.mxu3 %v213_v48  ;;  %467 = vmatpush.msra.mxu2 %v196_v49  ;;  %v30_v48 = vld [vmem:[%s1629_s0 + $0x38] sm:$0xff]  ;;  %v84_v49 = vld [vmem:[%s1629_s0 + $0x1e8] sm:$0xff] }
  0x4b   :  { %397 = vmatpush.msrb.mxu0 %v152_v50  ;;  %437 = vmatpush.msrb.mxu1 %v169_v51  ;;  %v37_v50 = vld [vmem:[%s1629_s0 + $0x70] sm:$0xff]  ;;  %v38_v51 = vld [vmem:[%s1629_s0 + $0x78] sm:$0xff] }
  0x4c   :  { %320 = vmatmul.f32.gmra.mxu2 %v33_v52  ;;  %508 = vmatpush.msra.mxu3 %v212_v53  ;;  %v45_v52 = vld [vmem:[%s1629_s0 + $0xb0] sm:$0xff]  ;;  %v46_v53 = vld [vmem:[%s1629_s0 + $0xb8] sm:$0xff] }
  0x4d   :  { %398 = vmatpush.msrb.mxu0 %v151_v54  ;;  %438 = vmatpush.msrb.mxu1 %v168_v55  ;;  %v53_v54 = vld [vmem:[%s1629_s0 + $0xf0] sm:$0xff]  ;;  %v54_v55 = vld [vmem:[%s1629_s0 + $0xf8] sm:$0xff] }
  0x4e   :  { %361 = vmatmul.f32.gmra.mxu3 %v34_v56  ;;  %399 = vmatmul.f32.vlgmr.msrb.gmra.mxu0 %v27_v57  ;;  %v61_v56 = vld [vmem:[%s1629_s0 + $0x130] sm:$0xff]  ;;  %v1429_v57 = vld [vmem:[%s1630_s3] ss:$0 sm:$0xff] }
  0x4f   :  { %439 = vmatpush.msrb.mxu1 %v167_v58  ;;  %468 = vmatpush.msra.mxu2 %v195_v59  ;;  %v62_v58 = vld [vmem:[%s1629_s0 + $0x138] sm:$0xff] }
  0x50   :  { %440 = vmatmul.f32.vlgmr.msrb.gmra.mxu1 %v28_v60  ;;  %509 = vmatpush.msra.mxu3 %v211_v61 }
  0x51   :  { %469 = vmatpush.msra.mxu2 %v194_v62 }
  0x52   :  { %510 = vmatpush.msra.mxu3 %v210_v63  ;;  %v69_v63 = vld [vmem:[%s1629_s0 + $0x170] sm:$0xff] }
  0x53   :  { %470 = vmatpush.msra.mxu2 %v193_v0  ;;  %v70_v0 = vld [vmem:[%s1629_s0 + $0x178] sm:$0xff] }
  0x54   :  { %323 = vmatmul.f32.gmra.mxu2 %v41_v1  ;;  %511 = vmatpush.msra.mxu3 %v209_v2 }
  0x55   :  { %471 = vmatpush.msra.mxu2 %v192_v3  ;;  %v562_v3 = vld [vmem:[%s1631_s2 + $0x78] sm:$0xff] }
  0x56   :  { %364 = vmatmul.f32.gmra.mxu3 %v42_v4  ;;  %402 = vmatmul.f32.gmra.mxu0 %v35_v5 }
  0x57   :  { %512 = vmatpush.msra.mxu3 %v208_v6  ;;  %472 = vmatpush.msra.mxu2 %v191_v7  ;;  %v561_v6 = vld [vmem:[%s1631_s2 + $0x70] sm:$0xff] }
  0x58   :  { %443 = vmatmul.f32.gmra.mxu1 %v36_v8  ;;  %563 = vmatpush.msra.mxu0 %v562_v3  ;;  %v77_v7 = vld [vmem:[%s1629_s0 + $0x1b0] sm:$0xff]  ;;  %v78_v8 = vld [vmem:[%s1629_s0 + $0x1b8] sm:$0xff] }
  0x59   :  { %513 = vmatpush.msra.mxu3 %v207_v9  ;;  %473 = vmatpush.msra.mxu2 %v190_v10  ;;  %v560_v10 = vld [vmem:[%s1631_s2 + $0x68] sm:$0xff] }
  0x5a   :  { %620 = vmatpush.msra.mxu1 %v562_v3  ;;  %564 = vmatpush.msra.mxu0 %v561_v6 }
  0x5b   :  { %514 = vmatpush.msra.mxu3 %v206_v11  ;;  %474 = vmatpush.msra.mxu2 %v189_v12 }
  0x5c   :  { %326 = vmatmul.f32.gmra.mxu2 %v49_v13  ;;  %621 = vmatpush.msra.mxu1 %v561_v6 }
  0x5d   :  { %515 = vmatpush.msra.mxu3 %v205_v14  ;;  %475 = vmatpush.msra.mxu2 %v188_v15  ;;  %v559_v14 = vld [vmem:[%s1631_s2 + $0x60] sm:$0xff]  ;;  %v85_v15 = vld [vmem:[%s1629_s0 + $0x1f0] sm:$0xff] }
  0x5e   :  { %367 = vmatmul.f32.gmra.mxu3 %v50_v16  ;;  %405 = vmatmul.f32.gmra.mxu0 %v43_v17  ;;  %v86_v16 = vld [vmem:[%s1629_s0 + $0x1f8] sm:$0xff] }
  0x5f   :  { %516 = vmatpush.msra.mxu3 %v204_v18  ;;  %476 = vmatpush.msra.mxu2 %v187_v19  ;;  %v558_v18 = vld [vmem:[%s1631_s2 + $0x58] sm:$0xff] }
  0x60   :  { %446 = vmatmul.f32.gmra.mxu1 %v44_v20  ;;  %565 = vmatpush.msra.mxu0 %v560_v10 }
  0x61   :  { %517 = vmatpush.msra.mxu3 %v203_v21  ;;  %477 = vmatpush.msra.mxu2 %v186_v22  ;;  %v557_v22 = vld [vmem:[%s1631_s2 + $0x50] sm:$0xff] }
  0x62   :  { %622 = vmatpush.msra.mxu1 %v560_v10  ;;  %566 = vmatpush.msra.mxu0 %v559_v14 }
  0x63   :  { %518 = vmatpush.msra.mxu3 %v202_v23  ;;  %478 = vmatpush.msra.mxu2 %v185_v24  ;;  %v556_v23 = vld [vmem:[%s1631_s2 + $0x48] sm:$0xff] }
  0x64   :  { %329 = vmatmul.f32.gmra.mxu2 %v57_v25  ;;  %623 = vmatpush.msra.mxu1 %v559_v14  ;;  %v555_v25 = vld [vmem:[%s1631_s2 + $0x40] sm:$0xff] }
  0x65   :  { %519 = vmatpush.msra.mxu3 %v201_v26  ;;  %479 = vmatpush.msra.mxu2 %v184_v27 }
  0x66   :  { %370 = vmatmul.f32.gmra.mxu3 %v58_v28  ;;  %408 = vmatmul.f32.gmra.mxu0 %v51_v29  ;;  %v554_v28 = vld [vmem:[%s1631_s2 + $0x38] sm:$0xff] }
  0x67   :  { %520 = vmatpush.msra.mxu3 %v200_v30  ;;  %480 = vmatpush.msra.mxu2 %v183_v31  ;;  %v553_v31 = vld [vmem:[%s1631_s2 + $0x30] sm:$0xff] }
  0x68   :  { %449 = vmatmul.f32.gmra.mxu1 %v52_v32  ;;  %567 = vmatpush.msra.mxu0 %v558_v18 }
  0x69   :  { %521 = vmatpush.msra.mxu3 %v199_v33  ;;  %624 = vmatpush.msra.mxu1 %v558_v18 }
  0x6a   :  { %568 = vmatpush.msra.mxu0 %v557_v22 }
  0x6b   :  { %625 = vmatpush.msra.mxu1 %v557_v22 }
  0x6c   :  { %332 = vmatmul.f32.gmra.mxu2 %v65_v34  ;;  %569 = vmatpush.msra.mxu0 %v556_v23  ;;  %v552_v34 = vld [vmem:[%s1631_s2 + $0x28] sm:$0xff] }
  0x6d   :  { %626 = vmatpush.msra.mxu1 %v556_v23 }
  0x6e   :  { %373 = vmatmul.f32.gmra.mxu3 %v66_v35  ;;  %411 = vmatmul.f32.gmra.mxu0 %v59_v36 }
  0x6f   :  { %570 = vmatpush.msra.mxu0 %v555_v25  ;;  %627 = vmatpush.msra.mxu1 %v555_v25 }
  0x70   :  { %452 = vmatmul.f32.gmra.mxu1 %v60_v37  ;;  %v551_v37 = vld [vmem:[%s1631_s2 + $0x20] sm:$0xff] }
  0x71   :  { %571 = vmatpush.msra.mxu0 %v554_v28  ;;  %628 = vmatpush.msra.mxu1 %v554_v28 }
  0x73   :  { %572 = vmatpush.msra.mxu0 %v553_v31  ;;  %629 = vmatpush.msra.mxu1 %v553_v31 }
  0x74   :  { %335 = vmatmul.f32.gmra.mxu2 %v73_v38 }
  0x75   :  { %573 = vmatpush.msra.mxu0 %v552_v34  ;;  %630 = vmatpush.msra.mxu1 %v552_v34 }
  0x76   :  { %376 = vmatmul.f32.gmra.mxu3 %v74_v39  ;;  %414 = vmatmul.f32.gmra.mxu0 %v67_v40  ;;  %v550_v39 = vld [vmem:[%s1631_s2 + $0x18] sm:$0xff] }
  0x77   :  { %574 = vmatpush.msra.mxu0 %v551_v37  ;;  %631 = vmatpush.msra.mxu1 %v551_v37 }
  0x78   :  { %455 = vmatmul.f32.gmra.mxu1 %v68_v41 }
  0x79   :  { %575 = vmatpush.msra.mxu0 %v550_v39  ;;  %632 = vmatpush.msra.mxu1 %v550_v39 }
  0x7c   :  { %338 = vmatmul.f32.gmra.mxu2 %v81_v42  ;;  %v549_v42 = vld [vmem:[%s1631_s2 + $0x10] sm:$0xff] }
  0x7d   :  { %576 = vmatpush.msra.mxu0 %v549_v42  ;;  %633 = vmatpush.msra.mxu1 %v549_v42 }
  0x7e   :  { %379 = vmatmul.f32.gmra.mxu3 %v82_v43  ;;  %417 = vmatmul.f32.gmra.mxu0 %v75_v44 }
  0x80   :  { %458 = vmatmul.f32.gmra.mxu1 %v76_v45  ;;  %v548_v45 = vld [vmem:[%s1631_s2 + $0x8] sm:$0xff] }
  0x81   :  { %577 = vmatpush.msra.mxu0 %v548_v45  ;;  %634 = vmatpush.msra.mxu1 %v548_v45 }
  0x84   :  { %481 = vmatmul.f32.vlgmr.msra.gmra.mxu2 %v29_v46 }
  0x86   :  { %420 = vmatmul.f32.gmra.mxu0 %v83_v47  ;;  %522 = vmatmul.f32.vlgmr.msra.gmra.mxu3 %v30_v48  ;;  %v547_v48 = vld [vmem:[%s1631_s2] sm:$0xff] }
  0x87   :  { %578 = vmatpush.msra.mxu0 %v547_v48  ;;  %635 = vmatpush.msra.mxu1 %v547_v48 }
  0x88   :  { %461 = vmatmul.f32.gmra.mxu1 %v84_v49 }
  0x8c   :  { %484 = vmatmul.f32.gmra.mxu2 %v37_v50 }
  0x8e   :  { %525 = vmatmul.f32.gmra.mxu3 %v38_v51 }
  0x94   :  { %487 = vmatmul.f32.gmra.mxu2 %v45_v52 }
  0x96   :  { %528 = vmatmul.f32.gmra.mxu3 %v46_v53 }
  0x9c   :  { %490 = vmatmul.f32.gmra.mxu2 %v53_v54 }
  0x9e   :  { %531 = vmatmul.f32.gmra.mxu3 %v54_v55 }
  0xa1   :  { %v236_v26 = vpop.f32.mrf.mxu0 }
  0xa2   :  { %v277_v29 = vpop.f32.mrf.mxu1  ;;  %v237_v54 = vadd.f32 %v1429_v57, %v236_v26 }
  0xa4   :  { %493 = vmatmul.f32.gmra.mxu2 %v61_v56  ;;  %v248_v59 = vpop.f32.mrf.mxu2  ;;  %v278_v56 = vadd.f32 %v277_v29, %v237_v54 }
  0xa5   :  { %v289_v60 = vpop.f32.mrf.mxu3  ;;  %v249_v61 = vadd.f32 %v1429_v57, %v248_v59 }
  0xa6   :  { %534 = vmatmul.f32.gmra.mxu3 %v62_v58 }
  0xa7   :  { %v1435_v62 = vadd.f32 %v289_v60, %v249_v61 }
  0xac   :  { %496 = vmatmul.f32.gmra.mxu2 %v69_v63  ;;  %v251_v1 = vpop.f32.mrf.mxu2 }
  0xad   :  { %v292_v2 = vpop.f32.mrf.mxu3  ;;  %v252_v4 = vadd.f32 %v1429_v57, %v251_v1  ;;  %v239_v33 = vpop.f32.mrf.mxu0 }
  0xae   :  { %537 = vmatmul.f32.gmra.mxu3 %v70_v0  ;;  %v240_v60 = vadd.f32 %v1429_v57, %v239_v33 }
  0xaf   :  { %v1447_v5 = vadd.f32 %v292_v2, %v252_v4 }
  0xb1   :  { %v280_v35 = vpop.f32.mrf.mxu1 }
  0xb2   :  { %v281_v0 = vadd.f32 %v280_v35, %v240_v60 }
  0xb4   :  { %499 = vmatmul.f32.gmra.mxu2 %v77_v7  ;;  %v254_v9 = vpop.f32.mrf.mxu2 }
  0xb5   :  { %v255_v11 = vadd.f32 %v1429_v57, %v254_v9  ;;  %v295_v12 = vpop.f32.mrf.mxu3 }
  0xb6   :  { %540 = vmatmul.f32.gmra.mxu3 %v78_v8 }
  0xb7   :  { %v1462_v13 = vadd.f32 %v295_v12, %v255_v11 }
  0xb8   :  { %v242_v40 = vpop.f32.mrf.mxu0 }
  0xb9   :  { %v243_v6 = vadd.f32 %v1429_v57, %v242_v40 }
  0xbc   :  { %502 = vmatmul.f32.gmra.mxu2 %v85_v15  ;;  %v257_v17 = vpop.f32.mrf.mxu2  ;;  %v283_v43 = vpop.f32.mrf.mxu1 }
  0xbd   :  { %v258_v19 = vadd.f32 %v1429_v57, %v257_v17  ;;  %v284_v10 = vadd.f32 %v283_v43, %v243_v6 }
  0xbe   :  { %543 = vmatmul.f32.gmra.mxu3 %v86_v16 }
  0xbf   :  { %v298_v20 = vpop.f32.mrf.mxu3 }
  0xc0   :  { %v1477_v21 = vadd.f32 %v298_v20, %v258_v19 }
  0xc2   :  { %v245_v46 = vpop.f32.mrf.mxu0 }
  0xc3   :  { %v246_v18 = vadd.f32 %v1429_v57, %v245_v46 }
  0xc5   :  { %v286_v50 = vpop.f32.mrf.mxu1 }
  0xc6   :  { %v318_v24 = vpop.f32.mrf.mxu2  ;;  %v287_v23 = vadd.f32 %v286_v50, %v246_v18 }
  0xc7   :  { %v319_v61 = vadd.f32 %v318_v24, %v278_v56 }
  0xc9   :  { %v359_v27 = vpop.f32.mrf.mxu3 }
  0xca   :  { %v360_v1 = vadd.f32 %v359_v27, %v319_v61 }
  0xcb   :  { %v400_v52 = vpop.f32.mrf.mxu0 }
  0xcc   :  { %v401_v7 = vadd.f32 %v400_v52, %v360_v1 }
  0xcd   :  { %v441_v55 = vpop.f32.mrf.mxu1 }
  0xce   :  { %v442_v11 = vadd.f32 %v441_v55, %v401_v7 }
  0xcf   :  { %v321_v30 = vpop.f32.mrf.mxu2 }
  0xd0   :  { %v322_v8 = vadd.f32 %v321_v30, %v281_v0 }
  0xd1   :  { %v362_v32 = vpop.f32.mrf.mxu3 }
  0xd2   :  { %v363_v12 = vadd.f32 %v362_v32, %v322_v8 }
  0xd3   :  { %v403_v63 = vpop.f32.mrf.mxu0 }
  0xd4   :  { %v404_v19 = vadd.f32 %v403_v63, %v363_v12 }
  0xd5   :  { %v444_v2 = vpop.f32.mrf.mxu1 }
  0xd6   :  { %v445_v24 = vadd.f32 %v444_v2, %v404_v19 }
  0xd7   :  { %v324_v36 = vpop.f32.mrf.mxu2 }
  0xd8   :  { %v325_v20 = vadd.f32 %v324_v36, %v284_v10 }
  0xd9   :  { %v365_v38 = vpop.f32.mrf.mxu3 }
  0xda   :  { %v366_v25 = vadd.f32 %v365_v38, %v325_v20 }
  0xdb   :  { %v406_v9 = vpop.f32.mrf.mxu0 }
  0xdc   :  { %v407_v30 = vadd.f32 %v406_v9, %v366_v25 }
  0xdd   :  { %v447_v16 = vpop.f32.mrf.mxu1 }
  0xde   :  { %v448_v57 = vadd.f32 %v447_v16, %v407_v30 }
  0xdf   :  { %v327_v41 = vpop.f32.mrf.mxu2 }
  0xe0   :  { %v328_v31 = vadd.f32 %v327_v41, %v287_v23 }
  0xe1   :  { %v368_v44 = vpop.f32.mrf.mxu3 }
  0xe2   :  { %v369_v34 = vadd.f32 %v368_v44, %v328_v31 }
  0xe3   :  { %v409_v26 = vpop.f32.mrf.mxu0 }
  0xe4   :  { %v410_v40 = vadd.f32 %v409_v26, %v369_v34 }
  0xe5   :  { %v450_v33 = vpop.f32.mrf.mxu1 }
  0xe6   :  { %v451_v45 = vadd.f32 %v450_v33, %v410_v40 }
  0xe7   :  { %v330_v47 = vpop.f32.mrf.mxu2 }
  0xe8   :  { %v331_v38 = vadd.f32 %v330_v47, %v1435_v62 }
  0xe9   :  { %v371_v49 = vpop.f32.mrf.mxu3 }
  0xea   :  { %v372_v46 = vadd.f32 %v371_v49, %v331_v38 }
  0xeb   :  { %v412_v37 = vpop.f32.mrf.mxu0 }
  0xec   :  { %v413_v52 = vadd.f32 %v412_v37, %v372_v46 }
  0xed   :  { %v453_v43 = vpop.f32.mrf.mxu1 }
  0xee   :  { %v454_v56 = vadd.f32 %v453_v43, %v413_v52 }
  0xef   :  { %v333_v51 = vpop.f32.mrf.mxu2 }
  0xf0   :  { %v334_v54 = vadd.f32 %v333_v51, %v1447_v5 }
  0xf1   :  { %v1512_v53 = vpop.f32.mrf.mxu3 }
  0xf2   :  { %v375_v60 = vadd.f32 %v1512_v53, %v334_v54 }
  0xf3   :  { %v415_v44 = vpop.f32.mrf.mxu0 }
  0xf4   :  { %v416_v0 = vadd.f32 %v415_v44, %v375_v60 }
  0xf5   :  { %v456_v61 = vpop.f32.mrf.mxu1 }
  0xf6   :  { %v457_v6 = vadd.f32 %v456_v61, %v416_v0 }
  0xf7   :  { %v1515_v58 = vpop.f32.mrf.mxu2 }
  0xf8   :  { %v337_v49 = vadd.f32 %v1515_v58, %v1462_v13 }
  0xf9   :  { %v1517_v59 = vpop.f32.mrf.mxu3 }
  0xfa   :  { %v378_v5 = vadd.f32 %v1517_v59, %v337_v49  ;;  %v1574_v49 = vld [vmem:[%s1632_s4] ss:$0 sm:$0xff] }
  0xfb   :  { %v418_v2 = vpop.f32.mrf.mxu0 }
  0xfc   :  { %v419_v10 = vadd.f32 %v418_v2, %v378_v5  ;;  %v1579_v5 = vld [vmem:[%s1633_s5] ss:$0 sm:$0xff] }
  0xfd   :  { %v459_v8 = vpop.f32.mrf.mxu1 }
  0xfe   :  { %v460_v12 = vadd.f32 %v459_v8, %v419_v10 }
  0xff   :  { %v1520_v3 = vpop.f32.mrf.mxu2 }
 0x100   :  { %v340_v53 = vadd.f32 %v1520_v3, %v1477_v21 }
 0x101   :  { %v1522_v4 = vpop.f32.mrf.mxu3 }
 0x103   :  { %v421_v13 = vpop.f32.mrf.mxu0 }
 0x105   :  { %v462_v59 = vpop.f32.mrf.mxu1 }
 0x107   :  { %v482_v14 = vpop.f32.mrf.mxu2 }
 0x108   :  { %v483_v15 = vadd.f32 %v482_v14, %v442_v11  ;;  %v381_v14 = vadd.f32 %v1522_v4, %v340_v53 }
 0x109   :  { %v523_v17 = vpop.f32.mrf.mxu3 }
 0x10a   :  { %v1526_v22 = vadd.f32 %v523_v17, %v483_v15  ;;  %v422_v17 = vadd.f32 %v421_v13, %v381_v14 }
 0x10c   :  { %579 = vmatmul.f32.vlgmr.msra.gmra.mxu0 %v1526_v22  ;;  %v463_v19 = vadd.f32 %v462_v59, %v422_v17 }
 0x10f   :  { %v485_v27 = vpop.f32.mrf.mxu2 }
 0x110   :  { %v486_v28 = vadd.f32 %v485_v27, %v445_v24 }
 0x111   :  { %v526_v29 = vpop.f32.mrf.mxu3 }
 0x112   :  { %v1529_v32 = vadd.f32 %v526_v29, %v486_v28 }
 0x114   :  { %582 = vmatmul.f32.gmra.mxu0 %v1529_v32 }
 0x117   :  { %v488_v35 = vpop.f32.mrf.mxu2 }
 0x118   :  { %v489_v36 = vadd.f32 %v488_v35, %v448_v57 }
 0x119   :  { %v529_v39 = vpop.f32.mrf.mxu3 }
 0x11a   :  { %v530_v42 = vadd.f32 %v529_v39, %v489_v36 }
 0x11c   :  { %585 = vmatmul.f32.gmra.mxu0 %v530_v42 }
 0x11f   :  { %v491_v41 = vpop.f32.mrf.mxu2 }
 0x120   :  { %v492_v48 = vadd.f32 %v491_v41, %v451_v45 }
 0x121   :  { %v532_v50 = vpop.f32.mrf.mxu3 }
 0x122   :  { %v533_v55 = vadd.f32 %v532_v50, %v492_v48 }
 0x124   :  { %588 = vmatmul.f32.gmra.mxu0 %v533_v55 }
 0x127   :  { %v494_v63 = vpop.f32.mrf.mxu2 }
 0x128   :  { %v495_v62 = vadd.f32 %v494_v63, %v454_v56 }
 0x129   :  { %v535_v47 = vpop.f32.mrf.mxu3 }
 0x12a   :  { %v536_v1 = vadd.f32 %v535_v47, %v495_v62 }
 0x12c   :  { %591 = vmatmul.f32.gmra.mxu0 %v536_v1 }
 0x12f   :  { %v497_v51 = vpop.f32.mrf.mxu2 }
 0x130   :  { %v498_v7 = vadd.f32 %v497_v51, %v457_v6 }
 0x131   :  { %v538_v9 = vpop.f32.mrf.mxu3 }
 0x132   :  { %v539_v11 = vadd.f32 %v538_v9, %v498_v7 }
 0x134   :  { %594 = vmatmul.f32.gmra.mxu0 %v539_v11 }
 0x137   :  { %v500_v58 = vpop.f32.mrf.mxu2 }
 0x138   :  { %v501_v15 = vadd.f32 %v500_v58, %v460_v12 }
 0x139   :  { %v541_v16 = vpop.f32.mrf.mxu3 }
 0x13a   :  { %v542_v18 = vadd.f32 %v541_v16, %v501_v15 }
 0x13c   :  { %597 = vmatmul.f32.gmra.mxu0 %v542_v18 }
 0x13f   :  { %v503_v20 = vpop.f32.mrf.mxu2 }
 0x140   :  { %v504_v23 = vadd.f32 %v503_v20, %v463_v19 }
 0x141   :  { %v544_v24 = vpop.f32.mrf.mxu3 }
 0x142   :  { %v545_v25 = vadd.f32 %v544_v24, %v504_v23 }
 0x144   :  { %600 = vmatmul.f32.gmra.mxu0 %v545_v25 }
 0x189   :  { %v580_v21 = vpop.f32.mrf.mxu0 }
 0x18a   :  { %v604_v3 = vsub.f32 %v1526_v22, %v580_v21 }
 0x18c   :  { %v612_v26 = vmul.f32 %v604_v3, %v604_v3 }
 0x18e   :  { %636 = vmatmul.f32.vlgmr.msra.gmra.mxu1 %v612_v26 }
 0x191   :  { %v583_v4 = vpop.f32.mrf.mxu0 }
 0x192   :  { %v1543_v27 = vsub.f32 %v1529_v32, %v583_v4 }
 0x194   :  { %v613_v28 = vmul.f32 %v1543_v27, %v1543_v27 }
 0x196   :  { %639 = vmatmul.f32.gmra.mxu1 %v613_v28 }
 0x199   :  { %v586_v29 = vpop.f32.mrf.mxu0 }
 0x19a   :  { %v1547_v30 = vsub.f32 %v530_v42, %v586_v29 }
 0x19c   :  { %v614_v31 = vmul.f32 %v1547_v30, %v1547_v30 }
 0x19e   :  { %642 = vmatmul.f32.gmra.mxu1 %v614_v31 }
 0x1a1   :  { %v589_v33 = vpop.f32.mrf.mxu0 }
 0x1a2   :  { %v1551_v57 = vsub.f32 %v533_v55, %v589_v33 }
 0x1a4   :  { %v615_v22 = vmul.f32 %v1551_v57, %v1551_v57 }
 0x1a6   :  { %645 = vmatmul.f32.gmra.mxu1 %v615_v22 }
 0x1a9   :  { %v592_v32 = vpop.f32.mrf.mxu0 }
 0x1aa   :  { %v1555_v34 = vsub.f32 %v536_v1, %v592_v32 }
 0x1ac   :  { %v616_v35 = vmul.f32 %v1555_v34, %v1555_v34 }
 0x1ae   :  { %648 = vmatmul.f32.gmra.mxu1 %v616_v35 }
 0x1b1   :  { %v595_v36 = vpop.f32.mrf.mxu0 }
 0x1b2   :  { %v1559_v37 = vsub.f32 %v539_v11, %v595_v36 }
 0x1b4   :  { %v617_v39 = vmul.f32 %v1559_v37, %v1559_v37 }
 0x1b6   :  { %651 = vmatmul.f32.gmra.mxu1 %v617_v39 }
 0x1b9   :  { %v598_v40 = vpop.f32.mrf.mxu0 }
 0x1ba   :  { %v1563_v38 = vsub.f32 %v542_v18, %v598_v40 }
 0x1bc   :  { %v618_v42 = vmul.f32 %v1563_v38, %v1563_v38 }
 0x1be   :  { %654 = vmatmul.f32.gmra.mxu1 %v618_v42 }
 0x1c1   :  { %v601_v43 = vpop.f32.mrf.mxu0 }
 0x1c2   :  { %v1567_v45 = vsub.f32 %v545_v25, %v601_v43 }
 0x1c4   :  { %v619_v46 = vmul.f32 %v1567_v45, %v1567_v45 }
 0x1c6   :  { %657 = vmatmul.f32.gmra.mxu1 %v619_v46 }
 0x20b   :  { %v637_v41 = vpop.f32.mrf.mxu1 }
 0x20c   :  { %v638_v48 = vadd.f32 1e-05, %v637_v41 }
 0x20e   :  { %820 = vrsqrt.f32 %v638_v48  ;;  %vm667_vm1 = vweird.f32 %v638_v48 }
 0x213   :  { %v640_v50 = vpop.f32.mrf.mxu1 }
 0x214   :  { %v821_v52 = vpop.eup %820  ;;  %v641_v54 = vadd.f32 1e-05, %v640_v50 }
 0x215   :  { %v662_v55 = vmul.f32 %v821_v52, %v638_v48  ;;  %vm668_vm0 = vweird.f32 %v821_v52 }
 0x216   :  { %822 = vrsqrt.f32 %v641_v54  ;;  %vm669_vm2 = vmor %vm667_vm1, %vm668_vm0  ;;  %vm677_vm4 = vweird.f32 %v641_v54 }
 0x217   :  { %v663_v44 = vmul.f32 %v821_v52, %v662_v55 }
 0x219   :  { %v664_v56 = vmul.f32 0.5, %v663_v44 }
 0x21b   :  { %v665_v60 = vsub.f32 1.5, %v664_v56  ;;  %v643_v61 = vpop.f32.mrf.mxu1 }
 0x21c   :  { %v823_v63 = vpop.eup %822  ;;  %v644_v62 = vadd.f32 1e-05, %v643_v61 }
 0x21d   :  { %v666_v47 = vmul.f32 %v821_v52, %v665_v60  ;;  %v672_v0 = vmul.f32 %v823_v63, %v641_v54  ;;  %vm678_vm3 = vweird.f32 %v823_v63 }
 0x21e   :  { %824 = vrsqrt.f32 %v644_v62  ;;  %vm679_vm5 = vmor %vm677_vm4, %vm678_vm3  ;;  %vm687_vm7 = vweird.f32 %v644_v62 }
 0x21f   :  { %v670_v1 = vsel %vm669_vm2, %v821_v52, %v666_v47  ;;  %v673_v2 = vmul.f32 %v823_v63, %v672_v0 }
 0x220   :  { %v741_v6 = vmul.f32 %v670_v1, %v604_v3 }
 0x221   :  { %v674_v51 = vmul.f32 0.5, %v673_v2 }
 0x222   :  { %v753_v7 = vmul.f32 %v1574_v49, %v741_v6 }
 0x223   :  { %v675_v8 = vsub.f32 1.5, %v674_v51  ;;  %v646_v9 = vpop.f32.mrf.mxu1 }
 0x224   :  { %v825_v10 = vpop.eup %824  ;;  %v765_v53 = vadd.f32 %v1579_v5, %v753_v7  ;;  %v647_v11 = vadd.f32 1e-05, %v646_v9 }
 0x225   :  { %v676_v12 = vmul.f32 %v823_v63, %v675_v8  ;;  %v682_v14 = vmul.f32 %v825_v10, %v644_v62  ;;  %vm688_vm6 = vweird.f32 %v825_v10 }
 0x226   :  { %773 = vst [vmem:[%s1634_s6] sm:$0xff] %v765_v53  ;;  %826 = vrsqrt.f32 %v647_v11  ;;  %vm689_vm8 = vmor %vm687_vm7, %vm688_vm6  ;;  %vm697_vm10 = vweird.f32 %v647_v11 }
 0x227   :  { %v680_v13 = vsel %vm679_vm5, %v823_v63, %v676_v12  ;;  %v683_v58 = vmul.f32 %v825_v10, %v682_v14 }
 0x228   :  { %v742_v15 = vmul.f32 %v680_v13, %v1543_v27 }
 0x229   :  { %v684_v16 = vmul.f32 0.5, %v683_v58 }
 0x22a   :  { %v754_v17 = vmul.f32 %v1574_v49, %v742_v15 }
 0x22b   :  { %v685_v18 = vsub.f32 1.5, %v684_v16  ;;  %v649_v59 = vpop.f32.mrf.mxu1 }
 0x22c   :  { %v827_v19 = vpop.eup %826  ;;  %v766_v20 = vadd.f32 %v1579_v5, %v754_v17  ;;  %v650_v23 = vadd.f32 1e-05, %v649_v59 }
 0x22d   :  { %v686_v24 = vmul.f32 %v825_v10, %v685_v18  ;;  %v692_v25 = vmul.f32 %v827_v19, %v647_v11  ;;  %vm698_vm9 = vweird.f32 %v827_v19 }
 0x22e   :  { %774 = vst [vmem:[%s1634_s6 + $0x8] sm:$0xff] %v766_v20  ;;  %828 = vrsqrt.f32 %v650_v23  ;;  %vm699_vm11 = vmor %vm697_vm10, %vm698_vm9  ;;  %vm707_vm13 = vweird.f32 %v650_v23 }
 0x22f   :  { %v690_v21 = vsel %vm689_vm8, %v825_v10, %v686_v24  ;;  %v693_v3 = vmul.f32 %v827_v19, %v692_v25 }
 0x230   :  { %v743_v26 = vmul.f32 %v690_v21, %v1547_v30 }
 0x231   :  { %v694_v4 = vmul.f32 0.5, %v693_v3 }
 0x232   :  { %v755_v27 = vmul.f32 %v1574_v49, %v743_v26 }
 0x233   :  { %v695_v28 = vsub.f32 1.5, %v694_v4  ;;  %v652_v29 = vpop.f32.mrf.mxu1 }
 0x234   :  { %v829_v31 = vpop.eup %828  ;;  %v767_v33 = vadd.f32 %v1579_v5, %v755_v27  ;;  %v653_v22 = vadd.f32 1e-05, %v652_v29 }
 0x235   :  { %v696_v32 = vmul.f32 %v827_v19, %v695_v28  ;;  %v702_v35 = vmul.f32 %v829_v31, %v650_v23  ;;  %vm708_vm12 = vweird.f32 %v829_v31 }
 0x236   :  { %775 = vst [vmem:[%s1634_s6 + $0x10] sm:$0xff] %v767_v33  ;;  %830 = vrsqrt.f32 %v653_v22  ;;  %vm709_vm14 = vmor %vm707_vm13, %vm708_vm12  ;;  %vm717_vm0 = vweird.f32 %v653_v22 }
 0x237   :  { %v700_v30 = vsel %vm699_vm11, %v827_v19, %v696_v32  ;;  %v703_v36 = vmul.f32 %v829_v31, %v702_v35 }
 0x238   :  { %v744_v39 = vmul.f32 %v700_v30, %v1551_v57 }
 0x239   :  { %v704_v40 = vmul.f32 0.5, %v703_v36 }
 0x23a   :  { %v756_v42 = vmul.f32 %v1574_v49, %v744_v39 }
 0x23b   :  { %v705_v43 = vsub.f32 1.5, %v704_v40  ;;  %v655_v46 = vpop.f32.mrf.mxu1 }
 0x23c   :  { %v831_v41 = vpop.eup %830  ;;  %v768_v48 = vadd.f32 %v1579_v5, %v756_v42  ;;  %v656_v50 = vadd.f32 1e-05, %v655_v46 }
 0x23d   :  { %v706_v52 = vmul.f32 %v829_v31, %v705_v43  ;;  %v712_v54 = vmul.f32 %v831_v41, %v653_v22  ;;  %vm718_vm15 = vweird.f32 %v831_v41 }
 0x23e   :  { %776 = vst [vmem:[%s1634_s6 + $0x18] sm:$0xff] %v768_v48  ;;  %832 = vrsqrt.f32 %v656_v50  ;;  %vm719_vm1 = vmor %vm717_vm0, %vm718_vm15  ;;  %vm727_vm3 = vweird.f32 %v656_v50 }
 0x23f   :  { %v710_v57 = vsel %vm709_vm14, %v829_v31, %v706_v52  ;;  %v713_v55 = vmul.f32 %v831_v41, %v712_v54 }
 0x240   :  { %v745_v44 = vmul.f32 %v710_v57, %v1555_v34 }
 0x241   :  { %v714_v56 = vmul.f32 0.5, %v713_v55 }
 0x242   :  { %v757_v60 = vmul.f32 %v1574_v49, %v745_v44 }
 0x243   :  { %v715_v61 = vsub.f32 1.5, %v714_v56  ;;  %v658_v63 = vpop.f32.mrf.mxu1 }
 0x244   :  { %v833_v62 = vpop.eup %832  ;;  %v769_v47 = vadd.f32 %v1579_v5, %v757_v60  ;;  %v659_v0 = vadd.f32 1e-05, %v658_v63 }
 0x245   :  { %v716_v1 = vmul.f32 %v831_v41, %v715_v61  ;;  %v722_v2 = vmul.f32 %v833_v62, %v656_v50  ;;  %vm728_vm2 = vweird.f32 %v833_v62 }
 0x246   :  { %777 = vst [vmem:[%s1634_s6 + $0x20] sm:$0xff] %v769_v47  ;;  %834 = vrsqrt.f32 %v659_v0  ;;  %vm729_vm4 = vmor %vm727_vm3, %vm728_vm2  ;;  %vm737_vm6 = vweird.f32 %v659_v0 }
 0x247   :  { %v720_v34 = vsel %vm719_vm1, %v831_v41, %v716_v1  ;;  %v723_v6 = vmul.f32 %v833_v62, %v722_v2 }
 0x248   :  { %v746_v51 = vmul.f32 %v720_v34, %v1559_v37 }
 0x249   :  { %v724_v7 = vmul.f32 0.5, %v723_v6 }
 0x24a   :  { %v758_v8 = vmul.f32 %v1574_v49, %v746_v51 }
 0x24b   :  { %v725_v9 = vsub.f32 1.5, %v724_v7 }
 0x24c   :  { %v835_v10 = vpop.eup %834  ;;  %v770_v53 = vadd.f32 %v1579_v5, %v758_v8 }
 0x24d   :  { %v726_v11 = vmul.f32 %v833_v62, %v725_v9  ;;  %v732_v12 = vmul.f32 %v835_v10, %v659_v0  ;;  %vm738_vm5 = vweird.f32 %v835_v10 }
 0x24e   :  { %778 = vst [vmem:[%s1634_s6 + $0x28] sm:$0xff] %v770_v53  ;;  %vm739_vm7 = vmor %vm737_vm6, %vm738_vm5 }
 0x24f   :  { %v730_v14 = vsel %vm729_vm4, %v833_v62, %v726_v11  ;;  %v733_v13 = vmul.f32 %v835_v10, %v732_v12 }
 0x250   :  { %v747_v37 = vmul.f32 %v730_v14, %v1563_v38 }
 0x251   :  { %v734_v58 = vmul.f32 0.5, %v733_v13 }
 0x252   :  { %v759_v15 = vmul.f32 %v1574_v49, %v747_v37 }
 0x253   :  { %v735_v16 = vsub.f32 1.5, %v734_v58 }
 0x254   :  { %v771_v17 = vadd.f32 %v1579_v5, %v759_v15 }
 0x255   :  { %v736_v18 = vmul.f32 %v835_v10, %v735_v16 }
 0x256   :  { %779 = vst [vmem:[%s1634_s6 + $0x30] sm:$0xff] %v771_v17 }
 0x257   :  { %v740_v59 = vsel %vm739_vm7, %v835_v10, %v736_v18 }
 0x258   :  { %v748_v19 = vmul.f32 %v740_v59, %v1567_v45 }
 0x25a   :  { %v760_v20 = vmul.f32 %v1574_v49, %v748_v19 }
 0x25c   :  { %v772_v38 = vadd.f32 %v1579_v5, %v760_v20 }
 0x25e   :  { %780 = vst [vmem:[%s1634_s6 + $0x38] sm:$0xff] %v772_v38 }

</bundles_post_ra>
